<compile_context>
chip_gen: v5e
topology: v5e:2x2
jax: 0.10.0
libtpu: 0.0.40
codegen_flags: <defaults>
</compile_context>

<pallas_src>
import functools

import jax
import jax.numpy as jnp
from jax.experimental import pallas as pl
from jax.experimental.pallas import tpu as pltpu


def _contract(a, b):
    """a:[m,k] @ b:[k,n]; when k == 1 use a VPU broadcast-multiply instead of a
    degenerate K=1 MXU pass."""
    if a.shape[-1] == 1:
        return a * b
    return jnp.dot(a, b, preferred_element_type=jnp.float32)


def _trunk_and_heads(x, w1_ref, b1_ref, w2_ref, b2_ref,
                     wmu_ref, bmu_ref, wsg_ref, bsg_ref, *, n_out):
    # fc1 -> ReLU -> fc2 -> ReLU  (weights already [in, out])
    h = jnp.maximum(_contract(x, w1_ref[...]) + b1_ref[...], 0.0)
    h = jnp.maximum(
        jnp.dot(h, w2_ref[...], preferred_element_type=jnp.float32) + b2_ref[...],
        0.0)
    # mu head: mean over the n_out logits
    y_mu = jnp.dot(h, wmu_ref[...], preferred_element_type=jnp.float32) + bmu_ref[...]
    mu = jnp.mean(y_mu, axis=-1, keepdims=True)
    # sigma head: unbiased std over the n_out logits (PyTorch .std default, ddof=1)
    y_sg = jnp.dot(h, wsg_ref[...], preferred_element_type=jnp.float32) + bsg_ref[...]
    m = jnp.mean(y_sg, axis=-1, keepdims=True)
    var = jnp.sum((y_sg - m) ** 2, axis=-1, keepdims=True) * (1.0 / (n_out - 1))
    std = jnp.sqrt(var)
    return mu, std


def _variance_nn_kernel(x_ref, w1_ref, b1_ref, w2_ref, b2_ref,
                        wmu_ref, bmu_ref, wsg_ref, bsg_ref,
                        mu_ref, std_ref, *, n_out):
    mu, std = _trunk_and_heads(x_ref[...], w1_ref, b1_ref, w2_ref, b2_ref,
                               wmu_ref, bmu_ref, wsg_ref, bsg_ref, n_out=n_out)
    mu_ref[...] = mu
    std_ref[...] = std


def _variance_nn_kernel_scaled(alpha_ref, x_ref, xt_t_ref, xt_sq_ref,
                               w1_ref, b1_ref, w2_ref, b2_ref,
                               wmu_ref, bmu_ref, wsg_ref, bsg_ref,
                               mu_ref, std_ref, *, n_out):
    x = x_ref[...]
    mu, std = _trunk_and_heads(x, w1_ref, b1_ref, w2_ref, b2_ref,
                               wmu_ref, bmu_ref, wsg_ref, bsg_ref, n_out=n_out)
    # scale = 1 + alpha * mean_j ||x_i - t_j||_2   (torch.cdist, p=2)
    # ||x - t||^2 = |x|^2 + |t|^2 - 2 x.t  — cross term via matmul against the
    # pre-transposed train set (no in-kernel transpose).
    alpha = alpha_ref[0]
    x_sq = jnp.sum(x * x, axis=-1, keepdims=True)               # [tm, 1]
    cross = _contract(x, xt_t_ref[...])                         # [tm, T]
    sq = jnp.maximum(x_sq + xt_sq_ref[...] - 2.0 * cross, 0.0)
    scale = 1.0 + alpha * jnp.mean(jnp.sqrt(sq), axis=-1, keepdims=True)
    mu_ref[...] = mu
    std_ref[...] = std * scale


def variance_nn_forward(x, params, *, train_x=None, alpha=0.0, tm=8):
    """Pallas implementation of VarianceNN.forward.

    x:       [B, input_dim] f32
    params:  (w1,b1,w2,b2,w_mu,b_mu,w_sigma,b_sigma) in PyTorch nn.Linear
             layout (weight = [out_features, in_features]).
    train_x: optional [T, input_dim] reference set (the module's X_train).
    returns: (mu [B,1], std [B,1])
    """
    w1, b1, w2, b2, wmu, bmu, wsg, bsg = params
    B, D = x.shape
    H = w1.shape[0]
    n_out = wmu.shape[0]

    # One-time wrapper-side transposes (PyTorch [out,in] -> [in,out]);
    # the kernel itself never transposes.
    w1t, w2t, wmut, wsgt = w1.T, w2.T, wmu.T, wsg.T
    b1r = b1.reshape(1, H)
    b2r = b2.reshape(1, H)
    bmur = bmu.reshape(1, n_out)
    bsgr = bsg.reshape(1, n_out)

    # Pad the batch to a multiple of tm so each grid block is sublane-aligned.
    B_pad = ((B + tm - 1) // tm) * tm
    x_p = jnp.pad(x, ((0, B_pad - B), (0, 0))) if B_pad != B else x
    grid = (B_pad // tm,)

    row = lambda i: (i, 0)      # batch-tiled operands
    const = lambda i: (0, 0)    # resident operands (weights / biases)

    weight_specs = [
        pl.BlockSpec((D, H), const), pl.BlockSpec((1, H), const),
        pl.BlockSpec((H, H), const), pl.BlockSpec((1, H), const),
        pl.BlockSpec((H, n_out), const), pl.BlockSpec((1, n_out), const),
        pl.BlockSpec((H, n_out), const), pl.BlockSpec((1, n_out), const),
    ]
    out_shape = (jax.ShapeDtypeStruct((B_pad, 1), jnp.float32),
                 jax.ShapeDtypeStruct((B_pad, 1), jnp.float32))
    out_specs = (pl.BlockSpec((tm, 1), row), pl.BlockSpec((tm, 1), row))
    cparams = pltpu.CompilerParams(dimension_semantics=("parallel",))

    if train_x is not None:
        T = train_x.shape[0]
        xt_t = train_x.T                                          # [D, T]
        xt_sq = jnp.sum(train_x * train_x, axis=-1).reshape(1, T)  # [1, T]
        alpha_arr = jnp.asarray([alpha], dtype=jnp.float32)        # runtime scalar in SMEM
        kernel = functools.partial(_variance_nn_kernel_scaled, n_out=n_out)
        in_specs = ([pl.BlockSpec(memory_space=pltpu.MemorySpace.SMEM),
                     pl.BlockSpec((tm, D), row),
                     pl.BlockSpec((D, T), const),
                     pl.BlockSpec((1, T), const)] + weight_specs)
        mu, std = pl.pallas_call(
            kernel, out_shape=out_shape, grid=grid,
            in_specs=in_specs, out_specs=out_specs,
            compiler_params=cparams,
        )(alpha_arr, x_p, xt_t, xt_sq, w1t, b1r, w2t, b2r, wmut, bmur, wsgt, bsgr)
    else:
        # No-scale variant: X_train / alpha never appear in the signature, so
        # no HBM->VMEM DMA is wasted on unused inputs.
        kernel = functools.partial(_variance_nn_kernel, n_out=n_out)
        in_specs = [pl.BlockSpec((tm, D), row)] + weight_specs
        mu, std = pl.pallas_call(
            kernel, out_shape=out_shape, grid=grid,
            in_specs=in_specs, out_specs=out_specs,
            compiler_params=cparams,
        )(x_p, w1t, b1r, w2t, b2r, wmut, bmur, wsgt, bsgr)

    return mu[:B], std[:B]


def _ref_forward(x, params, train_x, alpha):
    """Pure-JAX reference matching the PyTorch module semantics."""
    w1, b1, w2, b2, wmu, bmu, wsg, bsg = params
    h = jnp.maximum(x @ w1.T + b1, 0.0)
    h = jnp.maximum(h @ w2.T + b2, 0.0)
    mu = (h @ wmu.T + bmu).mean(axis=-1, keepdims=True)
    ys = h @ wsg.T + bsg
    std = jnp.std(ys, axis=-1, ddof=1, keepdims=True)
    if train_x is not None:
        sq = ((x[:, None, :] - train_x[None, :, :]) ** 2).sum(-1)
        dist = jnp.sqrt(jnp.maximum(sq, 0.0))
        std = std * (1.0 + alpha * dist.mean(axis=-1, keepdims=True))
    return mu, std


def init_params(key, input_dim, hidden_dim, n_out=10):
    """Deterministic init mirroring PyTorch nn.Linear defaults (layout [out, in])."""
    ks = jax.random.split(key, 8)

    def linear(kw, kb, fan_in, fan_out):
        bound = 1.0 / jnp.sqrt(jnp.float32(fan_in))
        w = jax.random.uniform(kw, (fan_out, fan_in), jnp.float32, -bound, bound)
        b = jax.random.uniform(kb, (fan_out,), jnp.float32, -bound, bound)
        return w, b

    w1, b1 = linear(ks[0], ks[1], input_dim, hidden_dim)
    w2, b2 = linear(ks[2], ks[3], hidden_dim, hidden_dim)
    wmu, bmu = linear(ks[4], ks[5], hidden_dim, n_out)
    wsg, bsg = linear(ks[6], ks[7], hidden_dim, n_out)
    return (w1, b1, w2, b2, wmu, bmu, wsg, bsg)


if __name__ == "__main__":
    key = jax.random.PRNGKey(0)
    input_dim, hidden_dim, n_out = 1, 32, 10
    batch = 20   # exercises the batch-padding path (pads to 24, grid of 3)

    k_params, k_x = jax.random.split(key)
    params = init_params(k_params, input_dim, hidden_dim, n_out)

    # The module's X_train: two 30-point linspace segments -> [60, 1].
    x1 = jnp.linspace(-3.0, -1.5, 30).reshape(-1, 1)
    x2 = jnp.linspace(1.5, 3.0, 30).reshape(-1, 1)
    X_train = jnp.concatenate([x1, x2], axis=0).astype(jnp.float32)

    x = jax.random.uniform(k_x, (batch, input_dim), jnp.float32, -3.0, 3.0)
    alpha = 0.3

    # Forward with distance-based scale factor (train_X is not None).
    mu, std = variance_nn_forward(x, params, train_x=X_train, alpha=alpha)
    mu, std = jax.block_until_ready(mu), jax.block_until_ready(std)

    # Forward without the scale factor (train_X is None).
    mu0, std0 = variance_nn_forward(x, params, train_x=None)
    mu0, std0 = jax.block_until_ready(mu0), jax.block_until_ready(std0)

    # Pure-JAX reference check.
    ref_mu, ref_std = _ref_forward(x, params, X_train, alpha)
    ref_mu0, ref_std0 = _ref_forward(x, params, None, 0.0)
    assert mu.shape == (batch, 1) and std.shape == (batch, 1)
    assert jnp.allclose(mu, ref_mu, atol=1e-4), "mu mismatch (scaled)"
    assert jnp.allclose(std, ref_std, atol=1e-4), "std mismatch (scaled)"
    assert jnp.allclose(mu0, ref_mu0, atol=1e-4), "mu mismatch (plain)"
    assert jnp.allclose(std0, ref_std0, atol=1e-4), "std mismatch (plain)"

    print("KERNEL_OK")
</pallas_src>

<mosaic_0001>
module attributes {stable_mosaic.version = 11 : i64} {
  func.func @_variance_nn_kernel_scaled(%arg0: i32, %arg1: memref<1xf32, #tpu.memory_space<smem>>, %arg2: memref<8x1xf32, #tpu.memory_space<vmem>>, %arg3: memref<1x60xf32, #tpu.memory_space<vmem>>, %arg4: memref<1x60xf32, #tpu.memory_space<vmem>>, %arg5: memref<1x32xf32, #tpu.memory_space<vmem>>, %arg6: memref<1x32xf32, #tpu.memory_space<vmem>>, %arg7: memref<32x32xf32, #tpu.memory_space<vmem>>, %arg8: memref<1x32xf32, #tpu.memory_space<vmem>>, %arg9: memref<32x10xf32, #tpu.memory_space<vmem>>, %arg10: memref<1x10xf32, #tpu.memory_space<vmem>>, %arg11: memref<32x10xf32, #tpu.memory_space<vmem>>, %arg12: memref<1x10xf32, #tpu.memory_space<vmem>>, %arg13: memref<8x1xf32, #tpu.memory_space<vmem>>, %arg14: memref<8x1xf32, #tpu.memory_space<vmem>>) attributes {dimension_semantics = [#tpu.dimension_semantics<parallel>], iteration_bounds = array<i64: 3>, scalar_prefetch = 0 : i64, scratch_operands = 0 : i64, tpu.core_type = #tpu.core_type<tc>, window_params = [{transform_indices = @transform_0, window_bounds = array<i64: 1>}, {transform_indices = @transform_1, window_bounds = array<i64: 8, 1>}, {pipeline_mode = #tpu.pipeline_mode<synchronous>, transform_indices = @transform_2, window_bounds = array<i64: 1, 60>}, {pipeline_mode = #tpu.pipeline_mode<synchronous>, transform_indices = @transform_3, window_bounds = array<i64: 1, 60>}, {pipeline_mode = #tpu.pipeline_mode<synchronous>, transform_indices = @transform_4, window_bounds = array<i64: 1, 32>}, {pipeline_mode = #tpu.pipeline_mode<synchronous>, transform_indices = @transform_5, window_bounds = array<i64: 1, 32>}, {pipeline_mode = #tpu.pipeline_mode<synchronous>, transform_indices = @transform_6, window_bounds = array<i64: 32, 32>}, {pipeline_mode = #tpu.pipeline_mode<synchronous>, transform_indices = @transform_7, window_bounds = array<i64: 1, 32>}, {pipeline_mode = #tpu.pipeline_mode<synchronous>, transform_indices = @transform_8, window_bounds = array<i64: 32, 10>}, {pipeline_mode = #tpu.pipeline_mode<synchronous>, transform_indices = @transform_9, window_bounds = array<i64: 1, 10>}, {pipeline_mode = #tpu.pipeline_mode<synchronous>, transform_indices = @transform_10, window_bounds = array<i64: 32, 10>}, {pipeline_mode = #tpu.pipeline_mode<synchronous>, transform_indices = @transform_11, window_bounds = array<i64: 1, 10>}, {transform_indices = @transform_12, window_bounds = array<i64: 8, 1>}, {transform_indices = @transform_13, window_bounds = array<i64: 8, 1>}]} {
    %c0 = arith.constant 0 : index
    %c0_0 = arith.constant 0 : index
    %0 = vector.load %arg2[%c0, %c0_0] : memref<8x1xf32, #tpu.memory_space<vmem>>, vector<8x1xf32>
    %c0_1 = arith.constant 0 : index
    %c0_2 = arith.constant 0 : index
    %1 = vector.load %arg5[%c0_1, %c0_2] : memref<1x32xf32, #tpu.memory_space<vmem>>, vector<1x32xf32>
    %2 = vector.broadcast %0 : vector<8x1xf32> to vector<8x32xf32>
    %3 = vector.broadcast %1 : vector<1x32xf32> to vector<8x32xf32>
    %4 = arith.mulf %2, %3 : vector<8x32xf32>
    %c0_3 = arith.constant 0 : index
    %c0_4 = arith.constant 0 : index
    %5 = vector.load %arg6[%c0_3, %c0_4] : memref<1x32xf32, #tpu.memory_space<vmem>>, vector<1x32xf32>
    %6 = vector.broadcast %5 : vector<1x32xf32> to vector<8x32xf32>
    %7 = arith.addf %4, %6 : vector<8x32xf32>
    %cst = arith.constant 0.000000e+00 : f32
    %8 = vector.broadcast %cst : f32 to vector<8x32xf32>
    %9 = arith.maximumf %7, %8 : vector<8x32xf32>
    %c0_5 = arith.constant 0 : index
    %c0_6 = arith.constant 0 : index
    %10 = vector.load %arg7[%c0_5, %c0_6] : memref<32x32xf32, #tpu.memory_space<vmem>>, vector<32x32xf32>
    %cst_7 = arith.constant dense<0.000000e+00> : vector<8x32xf32>
    %11 = tpu.matmul %9, %10, %cst_7 {dimension_numbers = #tpu.dot_dimension_numbers<[1], [0], [0], [1], [0, 0, 1, 1], [], []>} : vector<8x32xf32>, vector<32x32xf32>, vector<8x32xf32> -> vector<8x32xf32>
    %c0_8 = arith.constant 0 : index
    %c0_9 = arith.constant 0 : index
    %12 = vector.load %arg8[%c0_8, %c0_9] : memref<1x32xf32, #tpu.memory_space<vmem>>, vector<1x32xf32>
    %13 = vector.broadcast %12 : vector<1x32xf32> to vector<8x32xf32>
    %14 = arith.addf %11, %13 : vector<8x32xf32>
    %cst_10 = arith.constant 0.000000e+00 : f32
    %15 = vector.broadcast %cst_10 : f32 to vector<8x32xf32>
    %16 = arith.maximumf %14, %15 : vector<8x32xf32>
    %c0_11 = arith.constant 0 : index
    %c0_12 = arith.constant 0 : index
    %17 = vector.load %arg9[%c0_11, %c0_12] : memref<32x10xf32, #tpu.memory_space<vmem>>, vector<32x10xf32>
    %cst_13 = arith.constant dense<0.000000e+00> : vector<8x10xf32>
    %18 = tpu.matmul %16, %17, %cst_13 {dimension_numbers = #tpu.dot_dimension_numbers<[1], [0], [0], [1], [0, 0, 1, 1], [], []>} : vector<8x32xf32>, vector<32x10xf32>, vector<8x10xf32> -> vector<8x10xf32>
    %c0_14 = arith.constant 0 : index
    %c0_15 = arith.constant 0 : index
    %19 = vector.load %arg10[%c0_14, %c0_15] : memref<1x10xf32, #tpu.memory_space<vmem>>, vector<1x10xf32>
    %20 = vector.broadcast %19 : vector<1x10xf32> to vector<8x10xf32>
    %21 = arith.addf %18, %20 : vector<8x10xf32>
    %cst_16 = arith.constant dense<0.000000e+00> : vector<8xf32>
    %22 = vector.multi_reduction <add>, %21, %cst_16 [1] : vector<8x10xf32> to vector<8xf32>
    %23 = vector.shape_cast %22 : vector<8xf32> to vector<8x1xf32>
    %cst_17 = arith.constant 1.000000e+01 : f32
    %24 = vector.broadcast %cst_17 : f32 to vector<8x1xf32>
    %25 = arith.divf %23, %24 : vector<8x1xf32>
    %c0_18 = arith.constant 0 : index
    %c0_19 = arith.constant 0 : index
    %26 = vector.load %arg11[%c0_18, %c0_19] : memref<32x10xf32, #tpu.memory_space<vmem>>, vector<32x10xf32>
    %cst_20 = arith.constant dense<0.000000e+00> : vector<8x10xf32>
    %27 = tpu.matmul %16, %26, %cst_20 {dimension_numbers = #tpu.dot_dimension_numbers<[1], [0], [0], [1], [0, 0, 1, 1], [], []>} : vector<8x32xf32>, vector<32x10xf32>, vector<8x10xf32> -> vector<8x10xf32>
    %c0_21 = arith.constant 0 : index
    %c0_22 = arith.constant 0 : index
    %28 = vector.load %arg12[%c0_21, %c0_22] : memref<1x10xf32, #tpu.memory_space<vmem>>, vector<1x10xf32>
    %29 = vector.broadcast %28 : vector<1x10xf32> to vector<8x10xf32>
    %30 = arith.addf %27, %29 : vector<8x10xf32>
    %cst_23 = arith.constant dense<0.000000e+00> : vector<8xf32>
    %31 = vector.multi_reduction <add>, %30, %cst_23 [1] : vector<8x10xf32> to vector<8xf32>
    %32 = vector.shape_cast %31 : vector<8xf32> to vector<8x1xf32>
    %cst_24 = arith.constant 1.000000e+01 : f32
    %33 = vector.broadcast %cst_24 : f32 to vector<8x1xf32>
    %34 = arith.divf %32, %33 : vector<8x1xf32>
    %35 = vector.broadcast %34 : vector<8x1xf32> to vector<8x10xf32>
    %36 = arith.subf %30, %35 : vector<8x10xf32>
    %37 = arith.mulf %36, %36 : vector<8x10xf32>
    %cst_25 = arith.constant dense<0.000000e+00> : vector<8xf32>
    %38 = vector.multi_reduction <add>, %37, %cst_25 [1] : vector<8x10xf32> to vector<8xf32>
    %39 = vector.shape_cast %38 : vector<8xf32> to vector<8x1xf32>
    %cst_26 = arith.constant 0.111111112 : f32
    %40 = vector.broadcast %cst_26 : f32 to vector<8x1xf32>
    %41 = arith.mulf %39, %40 : vector<8x1xf32>
    %42 = math.sqrt %41 : vector<8x1xf32>
    %c0_27 = arith.constant 0 : index
    %43 = memref.load %arg1[%c0_27] : memref<1xf32, #tpu.memory_space<smem>>
    %44 = arith.mulf %0, %0 : vector<8x1xf32>
    %cst_28 = arith.constant dense<0.000000e+00> : vector<8xf32>
    %45 = vector.multi_reduction <add>, %44, %cst_28 [1] : vector<8x1xf32> to vector<8xf32>
    %46 = vector.shape_cast %45 : vector<8xf32> to vector<8x1xf32>
    %c0_29 = arith.constant 0 : index
    %c0_30 = arith.constant 0 : index
    %47 = vector.load %arg3[%c0_29, %c0_30] : memref<1x60xf32, #tpu.memory_space<vmem>>, vector<1x60xf32>
    %48 = vector.broadcast %0 : vector<8x1xf32> to vector<8x60xf32>
    %49 = vector.broadcast %47 : vector<1x60xf32> to vector<8x60xf32>
    %50 = arith.mulf %48, %49 : vector<8x60xf32>
    %c0_31 = arith.constant 0 : index
    %c0_32 = arith.constant 0 : index
    %51 = vector.load %arg4[%c0_31, %c0_32] : memref<1x60xf32, #tpu.memory_space<vmem>>, vector<1x60xf32>
    %52 = vector.broadcast %46 : vector<8x1xf32> to vector<8x60xf32>
    %53 = vector.broadcast %51 : vector<1x60xf32> to vector<8x60xf32>
    %54 = arith.addf %52, %53 : vector<8x60xf32>
    %cst_33 = arith.constant 2.000000e+00 : f32
    %55 = vector.broadcast %cst_33 : f32 to vector<8x60xf32>
    %56 = arith.mulf %55, %50 : vector<8x60xf32>
    %57 = arith.subf %54, %56 : vector<8x60xf32>
    %cst_34 = arith.constant 0.000000e+00 : f32
    %58 = vector.broadcast %cst_34 : f32 to vector<8x60xf32>
    %59 = arith.maximumf %57, %58 : vector<8x60xf32>
    %60 = math.sqrt %59 : vector<8x60xf32>
    %cst_35 = arith.constant dense<0.000000e+00> : vector<8xf32>
    %61 = vector.multi_reduction <add>, %60, %cst_35 [1] : vector<8x60xf32> to vector<8xf32>
    %62 = vector.shape_cast %61 : vector<8xf32> to vector<8x1xf32>
    %cst_36 = arith.constant 6.000000e+01 : f32
    %63 = vector.broadcast %cst_36 : f32 to vector<8x1xf32>
    %64 = arith.divf %62, %63 : vector<8x1xf32>
    %65 = vector.broadcast %43 : f32 to vector<8x1xf32>
    %66 = arith.mulf %65, %64 : vector<8x1xf32>
    %cst_37 = arith.constant 1.000000e+00 : f32
    %67 = vector.broadcast %cst_37 : f32 to vector<8x1xf32>
    %68 = arith.addf %67, %66 : vector<8x1xf32>
    %c0_38 = arith.constant 0 : index
    %c0_39 = arith.constant 0 : index
    %69 = vector.load %arg13[%c0_38, %c0_39] : memref<8x1xf32, #tpu.memory_space<vmem>>, vector<8x1xf32>
    tpu.vector_store %arg13[%c0_38, %c0_39], %25 {strides = array<i32>} : memref<8x1xf32, #tpu.memory_space<vmem>>, vector<8x1xf32>,
    %70 = arith.mulf %42, %68 : vector<8x1xf32>
    %c0_40 = arith.constant 0 : index
    %c0_41 = arith.constant 0 : index
    %71 = vector.load %arg14[%c0_40, %c0_41] : memref<8x1xf32, #tpu.memory_space<vmem>>, vector<8x1xf32>
    tpu.vector_store %arg14[%c0_40, %c0_41], %70 {strides = array<i32>} : memref<8x1xf32, #tpu.memory_space<vmem>>, vector<8x1xf32>,
    return
  }
  func.func @transform_0(%arg0: i32) -> i32 {
    %c0_i32 = arith.constant 0 : i32
    %c0_i32_0 = arith.constant 0 : i32
    return %c0_i32 : i32
  }
  func.func @transform_1(%arg0: i32) -> (i32, i32) {
    %c0_i32 = arith.constant 0 : i32
    %c0_i32_0 = arith.constant 0 : i32
    return %arg0, %c0_i32 : i32, i32
  }
  func.func @transform_2(%arg0: i32) -> (i32, i32) {
    %c0_i32 = arith.constant 0 : i32
    %c0_i32_0 = arith.constant 0 : i32
    %c0_i32_1 = arith.constant 0 : i32
    return %c0_i32, %c0_i32_0 : i32, i32
  }
  func.func @transform_3(%arg0: i32) -> (i32, i32) {
    %c0_i32 = arith.constant 0 : i32
    %c0_i32_0 = arith.constant 0 : i32
    %c0_i32_1 = arith.constant 0 : i32
    return %c0_i32, %c0_i32_0 : i32, i32
  }
  func.func @transform_4(%arg0: i32) -> (i32, i32) {
    %c0_i32 = arith.constant 0 : i32
    %c0_i32_0 = arith.constant 0 : i32
    %c0_i32_1 = arith.constant 0 : i32
    return %c0_i32, %c0_i32_0 : i32, i32
  }
  func.func @transform_5(%arg0: i32) -> (i32, i32) {
    %c0_i32 = arith.constant 0 : i32
    %c0_i32_0 = arith.constant 0 : i32
    %c0_i32_1 = arith.constant 0 : i32
    return %c0_i32, %c0_i32_0 : i32, i32
  }
  func.func @transform_6(%arg0: i32) -> (i32, i32) {
    %c0_i32 = arith.constant 0 : i32
    %c0_i32_0 = arith.constant 0 : i32
    %c0_i32_1 = arith.constant 0 : i32
    return %c0_i32, %c0_i32_0 : i32, i32
  }
  func.func @transform_7(%arg0: i32) -> (i32, i32) {
    %c0_i32 = arith.constant 0 : i32
    %c0_i32_0 = arith.constant 0 : i32
    %c0_i32_1 = arith.constant 0 : i32
    return %c0_i32, %c0_i32_0 : i32, i32
  }
  func.func @transform_8(%arg0: i32) -> (i32, i32) {
    %c0_i32 = arith.constant 0 : i32
    %c0_i32_0 = arith.constant 0 : i32
    %c0_i32_1 = arith.constant 0 : i32
    return %c0_i32, %c0_i32_0 : i32, i32
  }
  func.func @transform_9(%arg0: i32) -> (i32, i32) {
    %c0_i32 = arith.constant 0 : i32
    %c0_i32_0 = arith.constant 0 : i32
    %c0_i32_1 = arith.constant 0 : i32
    return %c0_i32, %c0_i32_0 : i32, i32
  }
  func.func @transform_10(%arg0: i32) -> (i32, i32) {
    %c0_i32 = arith.constant 0 : i32
    %c0_i32_0 = arith.constant 0 : i32
    %c0_i32_1 = arith.constant 0 : i32
    return %c0_i32, %c0_i32_0 : i32, i32
  }
  func.func @transform_11(%arg0: i32) -> (i32, i32) {
    %c0_i32 = arith.constant 0 : i32
    %c0_i32_0 = arith.constant 0 : i32
    %c0_i32_1 = arith.constant 0 : i32
    return %c0_i32, %c0_i32_0 : i32, i32
  }
  func.func @transform_12(%arg0: i32) -> (i32, i32) {
    %c0_i32 = arith.constant 0 : i32
    %c0_i32_0 = arith.constant 0 : i32
    return %arg0, %c0_i32 : i32, i32
  }
  func.func @transform_13(%arg0: i32) -> (i32, i32) {
    %c0_i32 = arith.constant 0 : i32
    %c0_i32_0 = arith.constant 0 : i32
    return %arg0, %c0_i32 : i32, i32
  }
}

</mosaic_0001>

<bundles_post_ra>
// kernel: tpu_custom_call.1
= control target key start
LH: loop header
LB: loop body
LE: loop exit
PB: predicated region body
PF: predicated region fallthrough
CT: control target
= control target key end

     0   :  { %s851_s27 = smov 0   ;;  %s941_s0 = inlined_call_operand.<no memory space> [shape: f32[1], index: 0, kind: input, shape index: {}]   ;;  %s942_s1 = inlined_call_operand.vmem [shape: f32[24,1], index: 1, kind: input, shape index: {}]   ;;  %s943_s2 = inlined_call_operand.vmem [shape: f32[1,60], index: 2, kind: input, shape index: {}]   ;;  %s944_s3 = inlined_call_operand.vmem [shape: f32[1,60], index: 3, kind: input, shape index: {}]   ;;  %s945_s4 = inlined_call_operand.vmem [shape: f32[1,32], index: 4, kind: input, shape index: {}]   ;;  %s946_s5 = inlined_call_operand.vmem [shape: f32[1,32], index: 5, kind: input, shape index: {}]   ;;  %s947_s6 = inlined_call_operand.vmem [shape: f32[32,32], index: 6, kind: input, shape index: {}]   ;;  %s948_s7 = inlined_call_operand.vmem [shape: f32[1,32], index: 7, kind: input, shape index: {}]   ;;  %s949_s8 = inlined_call_operand.vmem [shape: f32[32,10], index: 8, kind: input, shape index: {}]   ;;  %s950_s9 = inlined_call_operand.vmem [shape: f32[1,10], index: 9, kind: input, shape index: {}]   ;;  %s951_s10 = inlined_call_operand.vmem [shape: f32[32,10], index: 10, kind: input, shape index: {}]   ;;  %s952_s11 = inlined_call_operand.vmem [shape: f32[1,10], index: 11, kind: input, shape index: {}]   ;;  %s953_s12 = inlined_call_operand.vmem [shape: f32[24,1], index: 12, kind: output, shape index: {0}]   ;;  %s954_s13 = inlined_call_operand.vmem [shape: f32[24,1], index: 13, kind: output, shape index: {1}]  }
   0x1   :  { %19 = sst [smem:[#allocation2]] %s941_s0 }
   0x2 LB: > { %s727_s28 = sadd.s32 4294967295, %s773_s27   ;;  %p731_p0 = scmp.ge.s32.totalorder %s773_s27, 1  ;;  %s773_s27 = sphi %s851_s27, %s25_s27  }
   0x3   : > { %p390_p1 = scmp.lt.s32.totalorder %s773_s27, 4 }
   0x5   : > { %p391_p2 = pnand %p731_p0, %p390_p1 }
   0x6   : > { %p436_p3 = scmp.lt.s32.totalorder (!%p391_p2), %s727_s28, 2  ;;  %s591_s24 = sld [smem:[#allocation2]] (!%p391_p2) }
   0x7   : > { %394 = sbr.rel (%p391_p2) target bundleno = 667 (0x29b), region = 68 }
   0xc   : > { %v468_v0 = vld [vmem:[%s947_s6 + $0x18] sm:$0xff]  ;;  %v775_v1 = vmov 0   ;;  %s956_s28 = smov (!%p436_p3, %s727_s28), 2  ;;  %v467_v4 = vld [vmem:[%s947_s6 + $0x10] sm:$0xff]  ;;  %v466_v5 = vld [vmem:[%s947_s6 + $0x8] sm:$0xff]  ;;  %vm473_vm0 = vcmask 261120  }
   0xd   : > { %751 = vset.pattern.permute.xlu0 %v775_v1  ;;  %489 = vmatpush.msra.mxu0 %v468_v0  ;;  %s862_s0 = sshll.u32 %s956_s28, 3  ;;  %v465_v6 = vld [vmem:[%s947_s6] sm:$0xff]  ;;  %v501_v16 = vld [vmem:[%s949_s8 + $0x18] sm:$0xff]  ;;  %vm624_vm2 = vcmask 490496   ;;  %v500_v34 = vld [vmem:[%s949_s8 + $0x10] sm:$0xff]  ;;  %vm529_vm4 = vcmask 80896  }
   0xe   : > { %s439_s16 = scalar_lea.vmem %s942_s1, %s862_s0  ;;  %v752_v7 = vld [vmem:[%s945_s4] ss:$0 sm:$0xff]  ;;  %v544_v17 = vld [vmem:[%s951_s10 + $0x18] sm:$0xff]  ;;  %521 = vmatpush.msra.mxu1 %v501_v16  ;;  %v543_v35 = vld [vmem:[%s951_s10 + $0x10] sm:$0xff]  ;;  %v776_v52 = vmov 10.0   ;;  %s443_s23 = scalar_lea.vmem %s953_s12, %s862_s0  ;;  %vm639_vm6 = vcmask 7168  }
   0xf   : > { %v448_v2 = vld [vmem:[%s439_s16] sm:$0xff]  ;;  %490 = vmatpush.msra.mxu0 %v467_v4  ;;  %561 = vmatpush.msra.mxu2 %v544_v17  ;;  %v499_v36 = vld [vmem:[%s949_s8 + $0x8] sm:$0xff]  ;;  %v636_v17 = vstv %s591_s24  ;;  %s447_s28 = scalar_lea.vmem %s954_s13, %s862_s0 }
  0x10   : > { %452 = vperm.xlu0 %751, %v448_v2   ;;  %v592_v3 = vmul.f32 %v448_v2, %v448_v2  ;;  %v753_v8 = vld [vmem:[%s946_s5] ss:$0 sm:$0xff]  ;;  %522 = vmatpush.msra.mxu1 %v500_v34  ;;  %v542_v37 = vld [vmem:[%s951_s10 + $0x8] sm:$0xff] }
  0x11   : > { %491 = vmatpush.msra.mxu0 %v466_v5  ;;  %v754_v10 = vld [vmem:[%s943_s2] ss:$0 sm:$0xff]  ;;  %562 = vmatpush.msra.mxu2 %v543_v35 }
  0x12   : > { %v755_v15 = vld [vmem:[%s944_s3] ss:$0 sm:$0xff]  ;;  %523 = vmatpush.msra.mxu1 %v499_v36 }
  0x13   : > { %492 = vmatpush.msra.mxu0 %v465_v6  ;;  %563 = vmatpush.msra.mxu2 %v542_v37  ;;  %v498_v38 = vld [vmem:[%s949_s8] sm:$0xff] }
  0x14   : > { %v541_v39 = vld [vmem:[%s951_s10] sm:$0xff]  ;;  %524 = vmatpush.msra.mxu1 %v498_v38 }
  0x15   : > { %564 = vmatpush.msra.mxu2 %v541_v39  ;;  %v756_v40 = vld [vmem:[%s948_s7] ss:$0 sm:$0xff] }
  0x16   : > { %v757_v44 = vld [vmem:[%s950_s9] ss:$0 sm:$0xff] }
  0x17   : > { %v758_v48 = vld [vmem:[%s952_s11] ss:$0 sm:$0xff] }
  0x18   : > { %602 = vperm.xlu0 %751, %v592_v3   ;;  %v777_v3 = vmov 60.0  }
  0x82   : > { %v453_v9 = vpop.permute.xlu0 %452 }
  0x83   : > { %v458_v11 = vmul.f32 %v752_v7, %v453_v9  ;;  %v598_v13 = vmul.f32 %v754_v10, %v453_v9 }
  0x85   : > { %v463_v12 = vadd.f32 %v753_v8, %v458_v11  ;;  %v609_v19 = vmul.f32 2.0, %v598_v13 }
  0x87   : > { %v464_v14 = vmax.f32 %v463_v12, 0.0 }
  0x89   : > { %735 = vmatmul.msk.f32.vlgmr.msra.gmra.mxu0 %vm473_vm0, %v464_v14 }
  0x8a   : > { %v603_v18 = vpop.permute.xlu0 %602 }
  0x8b   : > { %v608_v20 = vadd.f32 %v755_v15, %v603_v18 }
  0x8d   : > { %v610_v21 = vsub.f32 %v608_v20, %v609_v19 }
  0x8f   : > { %v611_v22 = vmax.f32 %v610_v21, 0.0 }
  0x91   : > { %759 = vrsqrt.f32 %v611_v22  ;;  %vm619_vm1 = vcmp.eq.f32.partialorder %v611_v22, inf  ;;  %v622_v30 = vand.u32 2147483648, %v611_v22  ;;  %vm621_vm3 = vcmp.eq.f32.partialorder %v611_v22, 0.0 }
  0x92   : > { %761 = vrcp.f32 %v776_v52 }
  0x93   : > { %763 = vrcp.f32 %v777_v3 }
  0x97   : > { %v760_v23 = vpop.eup %759 }
  0x98   : > { %v613_v24 = vmul.f32 %v760_v23, %v611_v22  ;;  %v762_v53 = vpop.eup %761 }
  0x99   : > { %v534_v54 = vmul.f32 10.0, %v762_v53  ;;  %vm538_vm5 = vweird.f32 %v762_v53  ;;  %v764_v4 = vpop.eup %763 }
  0x9a   : > { %v614_v25 = vmul.f32 %v760_v23, %v613_v24  ;;  %v629_v5 = vmul.f32 60.0, %v764_v4  ;;  %vm633_vm7 = vweird.f32 %v764_v4 }
  0x9b   : > { %v535_v55 = vsub.f32 1.0, %v534_v54 }
  0x9c   : > { %v615_v26 = vmul.f32 0.5, %v614_v25  ;;  %v630_v6 = vsub.f32 1.0, %v629_v5 }
  0x9d   : > { %v536_v56 = vmul.f32 %v762_v53, %v535_v55 }
  0x9e   : > { %v616_v27 = vsub.f32 1.5, %v615_v26  ;;  %v631_v9 = vmul.f32 %v764_v4, %v630_v6 }
  0x9f   : > { %v537_v58 = vadd.f32 %v762_v53, %v536_v56 }
  0xa0   : > { %v617_v28 = vmul.f32 %v760_v23, %v616_v27  ;;  %v632_v10 = vadd.f32 %v764_v4, %v631_v9 }
  0xa1   : > { %v539_v59 = vsel %vm538_vm5, %v762_v53, %v537_v58 }
  0xa2   : > { %v618_v29 = vmul.f32 %v617_v28, %v611_v22  ;;  %v634_v13 = vsel %vm633_vm7, %v764_v4, %v632_v10 }
  0xa4   : > { %v620_v31 = vsel %vm619_vm1, %v611_v22, %v618_v29 }
  0xa5   : > { %v623_v32 = vsel %vm621_vm3, %v622_v30, %v620_v31 }
  0xa6   : > { %v625_v33 = vsel %vm624_vm2, %v623_v32, 0.0 }
  0xa7   : > { %626 = vadd.xlane.f32.xlu2 %v625_v33 }
 0x106   : > { %v494_v41 = vpop.f32.mrf.mxu0 }
 0x107   : > { %v495_v42 = vadd.f32 %v756_v40, %v494_v41 }
 0x109   : > { %v497_v43 = vmax.f32 %v495_v42, 0.0 }
 0x10b   : > { %736 = vmatmul.msk.f32.vlgmr.msra.gmra.mxu1 %vm473_vm0, %v497_v43  ;;  %737 = vmatmul.msk.f32.vlgmr.msra.gmra.mxu2 %vm473_vm0, %v497_v43 }
 0x11a   : > { %v627_v57 = vpop.xlane.xlu2 %626 }
 0x11b   : > { %v635_v15 = vmul.f32 %v634_v13, %v627_v57 }
 0x11d   : > { %v637_v19 = vmul.f32 %v636_v17, %v635_v15 }
 0x11f   : > { %v638_v23 = vadd.f32 1.0, %v637_v19 }
 0x188   : > { %v526_v45 = vpop.f32.mrf.mxu1 }
 0x189   : > { %v527_v46 = vadd.f32 %v757_v44, %v526_v45 }
 0x18b   : > { %v530_v47 = vsel %vm529_vm4, %v527_v46, 0.0 }
 0x18c   : > { %531 = vadd.xlane.f32.xlu2 %v530_v47 }
 0x18e   : > { %v566_v49 = vpop.f32.mrf.mxu2 }
 0x18f   : > { %v567_v50 = vadd.f32 %v758_v48, %v566_v49 }
 0x191   : > { %v569_v51 = vsel %vm529_vm4, %v567_v50, 0.0 }
 0x192   : > { %570 = vadd.xlane.f32.xlu1 %v569_v51 }
 0x1ff   : > { %v532_v60 = vpop.xlane.xlu2 %531 }
 0x200   : > { %v540_v61 = vmul.f32 %v539_v59, %v532_v60 }
 0x202   : > { %640 = vst.msk [vmem:[%s443_s23] sm:$0xff] %vm639_vm6, %v540_v61 }
 0x205   : > { %v571_v62 = vpop.xlane.xlu1 %570 }
 0x206   : > { %v572_v63 = vmul.f32 %v571_v62, %v539_v59 }
 0x208   : > { %v573_v0 = vsub.f32 %v567_v50, %v572_v63 }
 0x20a   : > { %v574_v1 = vmul.f32 %v573_v0, %v573_v0 }
 0x20c   : > { %v575_v2 = vsel %vm529_vm4, %v574_v1, 0.0 }
 0x20d   : > { %576 = vadd.xlane.f32.xlu1 %v575_v2 }
 0x280   : > { %v577_v7 = vpop.xlane.xlu1 %576 }
 0x281   : > { %v578_v8 = vmul.f32 0.11111111, %v577_v7 }
 0x283   : > { %765 = vrsqrt.f32 %v578_v8  ;;  %vm586_vm8 = vcmp.eq.f32.partialorder %v578_v8, inf  ;;  %v589_v22 = vand.u32 2147483648, %v578_v8  ;;  %vm588_vm9 = vcmp.eq.f32.partialorder %v578_v8, 0.0 }
 0x289   : > { %v766_v11 = vpop.eup %765 }
 0x28a   : > { %v580_v12 = vmul.f32 %v766_v11, %v578_v8 }
 0x28c   : > { %v581_v14 = vmul.f32 %v766_v11, %v580_v12 }
 0x28e   : > { %v582_v16 = vmul.f32 0.5, %v581_v14 }
 0x290   : > { %v583_v18 = vsub.f32 1.5, %v582_v16 }
 0x292   : > { %v584_v20 = vmul.f32 %v766_v11, %v583_v18 }
 0x294   : > { %v585_v21 = vmul.f32 %v584_v20, %v578_v8 }
 0x296   : > { %v587_v24 = vsel %vm586_vm8, %v578_v8, %v585_v21 }
 0x297   : > { %v590_v25 = vsel %vm588_vm9, %v589_v22, %v587_v24 }
 0x298   : > { %v641_v26 = vmul.f32 %v638_v23, %v590_v25 }
 0x29a   : > { %642 = vst.msk [vmem:[%s447_s28] sm:$0xff] %vm639_vm6, %v641_v26 }
 0x29b PF: > { %s25_s27 = sadd.s32 1, %s773_s27  }
 0x29c   : > { %p22_p4 = scmp.ge.s32.totalorder %s25_s27, 5  }
 0x29e   :  { %24 = sbr.rel (!%p22_p4) target bundleno = 2 (0x2), region = 110 }

</bundles_post_ra>
